<compile_context>
chip_gen: v7x
topology: tpu7x:2x2x1
jax: 0.10.0
libtpu: 0.0.40
codegen_flags: <defaults>
</compile_context>

<pallas_src>
import jax
import jax.numpy as jnp
from jax.experimental import pallas as pl
from jax.experimental.pallas import tpu as pltpu


def _round_up(x, m):
    return ((x + m - 1) // m) * m


def _vfr_kernel(x_ref, w1t_ref, b1_ref, w2t_ref, b2_ref, o_ref):
    # x_ref / o_ref: (B, C, TS) spatial-last tiles; weights/biases fully resident in VMEM.
    w1t = w1t_ref[...]          # (hidden, C)
    b1 = b1_ref[...]            # (hidden, 1) f32
    w2t = w2t_ref[...]          # (C, hidden)
    b2 = b2_ref[...]            # (C, 1) f32
    nb = x_ref.shape[0]
    for bi in range(nb):        # static unroll over the (small) batch dim folded into the block
        x = x_ref[bi]           # (C, TS) — native dtype, no up-cast (MXU accumulates in f32)
        h = jnp.dot(w1t, x, preferred_element_type=jnp.float32) + b1
        h = jax.nn.gelu(h, approximate=True)          # tanh form — EUP path
        h = h.astype(x.dtype)                         # keep the (hidden, TS) hand-off narrow
        out = jnp.dot(w2t, h, preferred_element_type=jnp.float32) + b2
        o_ref[bi] = out.astype(o_ref.dtype)


def _derive_tile_and_vmem(b, c, s, hidden, in_dtype, out_dtype):
    in_b = jnp.dtype(in_dtype).itemsize
    out_b = jnp.dtype(out_dtype).itemsize

    # Generation-aware usable VMEM budget.
    try:
        cap = pltpu.get_tpu_info().vmem_capacity_bytes
    except Exception:
        cap = 64 * 1024 * 1024                       # conservative (v7x-sized) fallback
    budget = (40 if cap <= 64 * 1024 * 1024 else 96) * 1024 * 1024

    # VMEM bytes needed per spatial lane of one tile:
    #   x (double-buffered) + out (double-buffered)
    #   + f32 hidden activations (pre/post GELU; conservatively counted live for all B
    #     unrolled batch iterations) + f32 pre-cast output tile.
    per_lane = (2 * b * c * in_b) + (2 * b * c * out_b) + (2 * b * hidden * 4) + (b * c * 4)

    ts = max(128, (budget // per_lane) // 128 * 128)
    ts = min(ts, _round_up(s, 128))                  # never larger than the spatial extent
    # Keep >= ~8 grid steps when there is enough data (v7x megacore sharding + pipeline
    # overlap), but never shrink a step below 2048 lanes (per-step overhead amortization).
    if s >= 8 * 2048:
        ts = min(ts, max(2048, _round_up(-(-s // 8), 128)))

    weight_bytes = 2 * (2 * hidden * c * 4 + (hidden + c) * 4)   # double-buffered, tiny
    need = per_lane * ts + weight_bytes
    vmem_limit = max(32 * 1024 * 1024,
                     min(budget, _round_up(need, 1 << 20) + 8 * 1024 * 1024))
    return ts, vmem_limit


def vector_field_regressor_pallas(x_bcs, w1t, b1, w2t, b2):
    """x_bcs: (B, C, S); channel MLP over C with spatial S as the lane axis. Returns (B, C, S)."""
    b, c, s = x_bcs.shape
    hidden = w1t.shape[0]
    ts, vmem_limit = _derive_tile_and_vmem(b, c, s, hidden, x_bcs.dtype, x_bcs.dtype)
    grid = (pl.cdiv(s, ts),)                         # ragged last tile handled by Pallas masking

    return pl.pallas_call(
        _vfr_kernel,
        out_shape=jax.ShapeDtypeStruct((b, c, s), x_bcs.dtype),
        grid_spec=pltpu.PrefetchScalarGridSpec(
            num_scalar_prefetch=0,
            grid=grid,
            in_specs=[
                pl.BlockSpec((b, c, ts), lambda si: (0, 0, si)),     # x: batch folded into block
                pl.BlockSpec((hidden, c), lambda si: (0, 0)),        # W1ᵀ (grid-invariant)
                pl.BlockSpec((hidden, 1), lambda si: (0, 0)),        # b1
                pl.BlockSpec((c, hidden), lambda si: (0, 0)),        # W2ᵀ (grid-invariant)
                pl.BlockSpec((c, 1), lambda si: (0, 0)),             # b2
            ],
            out_specs=pl.BlockSpec((b, c, ts), lambda si: (0, 0, si)),
        ),
        compiler_params=pltpu.CompilerParams(
            dimension_semantics=("parallel",),
            vmem_limit_bytes=vmem_limit,
        ),
    )(x_bcs, w1t, b1, w2t, b2)


def submodel_forward(x_nchw, params):
    """SubModel.forward: returns vector_field_regressor(input_latents=x). Shape-preserving."""
    b, c, h, w = x_nchw.shape
    # NCHW -> (B, C, H*W): trailing-dim reshape only, no HBM transpose pass.
    x_bcs = x_nchw.reshape(b, c, h * w)
    # Pre-orient the tiny weights once so the kernel's dots are spatial-last with no
    # in-kernel transposes; weights in the input dtype, biases kept f32 (added post-accum).
    w1t = params["w1"].T.astype(x_bcs.dtype)          # (hidden, C)
    b1 = params["b1"].reshape(-1, 1).astype(jnp.float32)
    w2t = params["w2"].T.astype(x_bcs.dtype)          # (C, hidden)
    b2 = params["b2"].reshape(-1, 1).astype(jnp.float32)
    out_bcs = vector_field_regressor_pallas(x_bcs, w1t, b1, w2t, b2)
    return out_bcs.reshape(b, c, h, w)


def init_params(key, c, hidden):
    k1, k2, k3, k4 = jax.random.split(key, 4)
    return {
        "w1": jax.random.normal(k1, (c, hidden), jnp.float32) * 0.1,
        "b1": jax.random.normal(k2, (1, hidden), jnp.float32) * 0.01,
        "w2": jax.random.normal(k3, (hidden, c), jnp.float32) * 0.1,
        "b2": jax.random.normal(k4, (1, c), jnp.float32) * 0.01,
    }


def _reference(x_nchw, params):
    b, c, h, w = x_nchw.shape
    t = jnp.transpose(x_nchw, (0, 2, 3, 1)).reshape(b * h * w, c)
    hdd = jax.nn.gelu(t @ params["w1"] + params["b1"], approximate=True)
    o = hdd @ params["w2"] + params["b2"]
    return jnp.transpose(o.reshape(b, h, w, c), (0, 3, 1, 2))


if __name__ == "__main__":
    key = jax.random.PRNGKey(0)
    kx, kp = jax.random.split(key)

    B, C, H, W = 2, 4, 16, 16
    HIDDEN = 32

    x = jax.random.normal(kx, (B, C, H, W), jnp.float32)
    params = init_params(kp, C, HIDDEN)

    out = submodel_forward(x, params)
    out = jax.block_until_ready(out)

    ref = _reference(x, params)
    assert out.shape == (B, C, H, W)
    # Tolerance covers possible MXU-pass precision differences between XLA's and Mosaic's
    # f32 matmul paths; structural errors would be orders of magnitude larger.
    assert jnp.allclose(out, ref, atol=5e-3, rtol=5e-3), "mismatch vs pure-JAX reference"

    print("KERNEL_OK")
</pallas_src>

<mosaic_0001>
module attributes {stable_mosaic.version = 11 : i64} {
  func.func @_vfr_kernel(%arg0: i32, %arg1: memref<2x4x256xf32, #tpu.memory_space<vmem>>, %arg2: memref<32x4xf32, #tpu.memory_space<vmem>>, %arg3: memref<32x1xf32, #tpu.memory_space<vmem>>, %arg4: memref<4x32xf32, #tpu.memory_space<vmem>>, %arg5: memref<4x1xf32, #tpu.memory_space<vmem>>, %arg6: memref<2x4x256xf32, #tpu.memory_space<vmem>>) attributes {dimension_semantics = [#tpu.dimension_semantics<parallel>], iteration_bounds = array<i64: 1>, scalar_prefetch = 0 : i64, scratch_operands = 0 : i64, tpu.core_type = #tpu.core_type<tc>, window_params = [{transform_indices = @transform_0, window_bounds = array<i64: 2, 4, 256>}, {pipeline_mode = #tpu.pipeline_mode<synchronous>, transform_indices = @transform_1, window_bounds = array<i64: 32, 4>}, {pipeline_mode = #tpu.pipeline_mode<synchronous>, transform_indices = @transform_2, window_bounds = array<i64: 32, 1>}, {pipeline_mode = #tpu.pipeline_mode<synchronous>, transform_indices = @transform_3, window_bounds = array<i64: 4, 32>}, {pipeline_mode = #tpu.pipeline_mode<synchronous>, transform_indices = @transform_4, window_bounds = array<i64: 4, 1>}, {transform_indices = @transform_5, window_bounds = array<i64: 2, 4, 256>}]} {
    %c0 = arith.constant 0 : index
    %c0_0 = arith.constant 0 : index
    %0 = vector.load %arg2[%c0, %c0_0] : memref<32x4xf32, #tpu.memory_space<vmem>>, vector<32x4xf32>
    %c0_1 = arith.constant 0 : index
    %c0_2 = arith.constant 0 : index
    %1 = vector.load %arg3[%c0_1, %c0_2] : memref<32x1xf32, #tpu.memory_space<vmem>>, vector<32x1xf32>
    %c0_3 = arith.constant 0 : index
    %c0_4 = arith.constant 0 : index
    %2 = vector.load %arg4[%c0_3, %c0_4] : memref<4x32xf32, #tpu.memory_space<vmem>>, vector<4x32xf32>
    %c0_5 = arith.constant 0 : index
    %c0_6 = arith.constant 0 : index
    %3 = vector.load %arg5[%c0_5, %c0_6] : memref<4x1xf32, #tpu.memory_space<vmem>>, vector<4x1xf32>
    %c0_7 = arith.constant 0 : index
    %c0_8 = arith.constant 0 : index
    %c0_9 = arith.constant 0 : index
    %4 = vector.load %arg1[%c0_7, %c0_8, %c0_9] : memref<2x4x256xf32, #tpu.memory_space<vmem>>, vector<1x4x256xf32>
    %5 = vector.shape_cast %4 : vector<1x4x256xf32> to vector<4x256xf32>
    %cst = arith.constant dense<0.000000e+00> : vector<32x256xf32>
    %6 = tpu.matmul %0, %5, %cst {dimension_numbers = #tpu.dot_dimension_numbers<[1], [0], [0], [1], [0, 0, 1, 1], [], []>} : vector<32x4xf32>, vector<4x256xf32>, vector<32x256xf32> -> vector<32x256xf32>
    %7 = vector.broadcast %1 : vector<32x1xf32> to vector<32x256xf32>
    %8 = arith.addf %6, %7 : vector<32x256xf32>
    %9 = arith.mulf %8, %8 : vector<32x256xf32>
    %10 = arith.mulf %8, %9 : vector<32x256xf32>
    %cst_10 = arith.constant 4.471500e-02 : f32
    %11 = vector.broadcast %cst_10 : f32 to vector<32x256xf32>
    %12 = arith.mulf %11, %10 : vector<32x256xf32>
    %13 = arith.addf %8, %12 : vector<32x256xf32>
    %cst_11 = arith.constant 0.797884583 : f32
    %14 = vector.broadcast %cst_11 : f32 to vector<32x256xf32>
    %15 = arith.mulf %14, %13 : vector<32x256xf32>
    %16 = math.tanh %15 : vector<32x256xf32>
    %cst_12 = arith.constant 1.000000e+00 : f32
    %17 = vector.broadcast %cst_12 : f32 to vector<32x256xf32>
    %18 = arith.addf %17, %16 : vector<32x256xf32>
    %cst_13 = arith.constant 5.000000e-01 : f32
    %19 = vector.broadcast %cst_13 : f32 to vector<32x256xf32>
    %20 = arith.mulf %19, %18 : vector<32x256xf32>
    %21 = arith.mulf %8, %20 : vector<32x256xf32>
    %cst_14 = arith.constant dense<0.000000e+00> : vector<4x256xf32>
    %22 = tpu.matmul %2, %21, %cst_14 {dimension_numbers = #tpu.dot_dimension_numbers<[1], [0], [0], [1], [0, 0, 1, 1], [], []>} : vector<4x32xf32>, vector<32x256xf32>, vector<4x256xf32> -> vector<4x256xf32>
    %23 = vector.broadcast %3 : vector<4x1xf32> to vector<4x256xf32>
    %24 = arith.addf %22, %23 : vector<4x256xf32>
    %c0_15 = arith.constant 0 : index
    %c0_16 = arith.constant 0 : index
    %c0_17 = arith.constant 0 : index
    %25 = vector.load %arg6[%c0_15, %c0_16, %c0_17] : memref<2x4x256xf32, #tpu.memory_space<vmem>>, vector<1x4x256xf32>
    %26 = vector.shape_cast %25 : vector<1x4x256xf32> to vector<4x256xf32>
    %27 = vector.shape_cast %24 : vector<4x256xf32> to vector<1x4x256xf32>
    tpu.vector_store %arg6[%c0_15, %c0_16, %c0_17], %27 {strides = array<i32>} : memref<2x4x256xf32, #tpu.memory_space<vmem>>, vector<1x4x256xf32>,
    %c1 = arith.constant 1 : index
    %c0_18 = arith.constant 0 : index
    %c0_19 = arith.constant 0 : index
    %28 = vector.load %arg1[%c1, %c0_18, %c0_19] : memref<2x4x256xf32, #tpu.memory_space<vmem>>, vector<1x4x256xf32>
    %29 = vector.shape_cast %28 : vector<1x4x256xf32> to vector<4x256xf32>
    %cst_20 = arith.constant dense<0.000000e+00> : vector<32x256xf32>
    %30 = tpu.matmul %0, %29, %cst_20 {dimension_numbers = #tpu.dot_dimension_numbers<[1], [0], [0], [1], [0, 0, 1, 1], [], []>} : vector<32x4xf32>, vector<4x256xf32>, vector<32x256xf32> -> vector<32x256xf32>
    %31 = vector.broadcast %1 : vector<32x1xf32> to vector<32x256xf32>
    %32 = arith.addf %30, %31 : vector<32x256xf32>
    %33 = arith.mulf %32, %32 : vector<32x256xf32>
    %34 = arith.mulf %32, %33 : vector<32x256xf32>
    %cst_21 = arith.constant 4.471500e-02 : f32
    %35 = vector.broadcast %cst_21 : f32 to vector<32x256xf32>
    %36 = arith.mulf %35, %34 : vector<32x256xf32>
    %37 = arith.addf %32, %36 : vector<32x256xf32>
    %cst_22 = arith.constant 0.797884583 : f32
    %38 = vector.broadcast %cst_22 : f32 to vector<32x256xf32>
    %39 = arith.mulf %38, %37 : vector<32x256xf32>
    %40 = math.tanh %39 : vector<32x256xf32>
    %cst_23 = arith.constant 1.000000e+00 : f32
    %41 = vector.broadcast %cst_23 : f32 to vector<32x256xf32>
    %42 = arith.addf %41, %40 : vector<32x256xf32>
    %cst_24 = arith.constant 5.000000e-01 : f32
    %43 = vector.broadcast %cst_24 : f32 to vector<32x256xf32>
    %44 = arith.mulf %43, %42 : vector<32x256xf32>
    %45 = arith.mulf %32, %44 : vector<32x256xf32>
    %cst_25 = arith.constant dense<0.000000e+00> : vector<4x256xf32>
    %46 = tpu.matmul %2, %45, %cst_25 {dimension_numbers = #tpu.dot_dimension_numbers<[1], [0], [0], [1], [0, 0, 1, 1], [], []>} : vector<4x32xf32>, vector<32x256xf32>, vector<4x256xf32> -> vector<4x256xf32>
    %47 = vector.broadcast %3 : vector<4x1xf32> to vector<4x256xf32>
    %48 = arith.addf %46, %47 : vector<4x256xf32>
    %c1_26 = arith.constant 1 : index
    %c0_27 = arith.constant 0 : index
    %c0_28 = arith.constant 0 : index
    %49 = vector.load %arg6[%c1_26, %c0_27, %c0_28] : memref<2x4x256xf32, #tpu.memory_space<vmem>>, vector<1x4x256xf32>
    %50 = vector.shape_cast %49 : vector<1x4x256xf32> to vector<4x256xf32>
    %51 = vector.shape_cast %48 : vector<4x256xf32> to vector<1x4x256xf32>
    tpu.vector_store %arg6[%c1_26, %c0_27, %c0_28], %51 {strides = array<i32>} : memref<2x4x256xf32, #tpu.memory_space<vmem>>, vector<1x4x256xf32>,
    return
  }
  func.func @transform_0(%arg0: i32) -> (i32, i32, i32) {
    %c0_i32 = arith.constant 0 : i32
    %c0_i32_0 = arith.constant 0 : i32
    %c0_i32_1 = arith.constant 0 : i32
    return %c0_i32, %c0_i32_0, %arg0 : i32, i32, i32
  }
  func.func @transform_1(%arg0: i32) -> (i32, i32) {
    %c0_i32 = arith.constant 0 : i32
    %c0_i32_0 = arith.constant 0 : i32
    %c0_i32_1 = arith.constant 0 : i32
    return %c0_i32, %c0_i32_0 : i32, i32
  }
  func.func @transform_2(%arg0: i32) -> (i32, i32) {
    %c0_i32 = arith.constant 0 : i32
    %c0_i32_0 = arith.constant 0 : i32
    %c0_i32_1 = arith.constant 0 : i32
    return %c0_i32, %c0_i32_0 : i32, i32
  }
  func.func @transform_3(%arg0: i32) -> (i32, i32) {
    %c0_i32 = arith.constant 0 : i32
    %c0_i32_0 = arith.constant 0 : i32
    %c0_i32_1 = arith.constant 0 : i32
    return %c0_i32, %c0_i32_0 : i32, i32
  }
  func.func @transform_4(%arg0: i32) -> (i32, i32) {
    %c0_i32 = arith.constant 0 : i32
    %c0_i32_0 = arith.constant 0 : i32
    %c0_i32_1 = arith.constant 0 : i32
    return %c0_i32, %c0_i32_0 : i32, i32
  }
  func.func @transform_5(%arg0: i32) -> (i32, i32, i32) {
    %c0_i32 = arith.constant 0 : i32
    %c0_i32_0 = arith.constant 0 : i32
    %c0_i32_1 = arith.constant 0 : i32
    return %c0_i32, %c0_i32_0, %arg0 : i32, i32, i32
  }
}

</mosaic_0001>

<bundles_post_ra>
// kernel: tpu_custom_call.1
= control target key start
LH: loop header
LB: loop body
LE: loop exit
PB: predicated region body
PF: predicated region fallthrough
CT: control target
= control target key end

     0   :  { %vm67_vm0 = vcmask 1043456   ;;  %v676_v2 = vmov 0.0   ;;  %vm54_vm1 = vcmask 31744   ;;  %v677_v5 = vmov 0   ;;  %s938_s0 = inlined_call_operand.vmem [shape: f32[2,4,256], index: 0, kind: input, shape index: {}]   ;;  %s939_s1 = inlined_call_operand.vmem [shape: f32[32,4], index: 1, kind: input, shape index: {}]   ;;  %s940_s2 = inlined_call_operand.vmem [shape: f32[32,1], index: 2, kind: input, shape index: {}]   ;;  %s941_s3 = inlined_call_operand.vmem [shape: f32[4,32], index: 3, kind: input, shape index: {}]   ;;  %s942_s4 = inlined_call_operand.vmem [shape: f32[4,1], index: 4, kind: input, shape index: {}]   ;;  %s943_s5 = inlined_call_operand.hbm [shape: f32[2,4,256], index: 5, kind: output, shape index: {}]  }
   0x1   :  { %v31_v0 = vld [vmem:[%s938_s0] sm:$0xff]  ;;  %136 = vmatprep.mubr.f32.mxu0 %v676_v2  ;;  %306 = vmatprep.mubr.f32.mxu1 %v676_v2  ;;  %v27_v6 = vld [vmem:[%s940_s2 + $0x10] sm:$0xff] }
   0x2   :  { %v53_v1 = vcombine.high %v31_v0, %v31_v0  ;;  %v25_v3 = vld [vmem:[%s940_s2] sm:$0xff]  ;;  %616 = vset.pattern.permute.xlu0 %v677_v5  ;;  %617 = vset.pattern.permute.xlu1 %v677_v5 }
   0x3   :  { %v722_v4 = vld [vmem:[%s939_s1] sm:$0xff]  ;;  %34 = vperm.xlu0 %616, %v25_v3  }
   0x4   :  { %580 = vmatprep.subr.msk.mxu0 %vm67_vm0, %v53_v1 }
   0x5   :  { %10 = vsyncpa [#allocation3], 0  ;;  %581 = vmatpush1.msk.msra.mxu0 %vm67_vm0, %v31_v0  ;;  %v26_v7 = vld [vmem:[%s940_s2 + $0x8] sm:$0xff]  ;;  %44 = vperm.xlu1 %617, %v27_v6   ;;  %v28_v8 = vld [vmem:[%s940_s2 + $0x18] sm:$0xff]  ;;  %vm238_vm2 = vcmask 261120  }
   0x6   :  { %582 = vmatmul.mubr.msk.f32.vlgmr.msra.gmra.mrb[0].mxu0 %vm54_vm1, %v722_v4  ;;  %v741_v9 = vld [vmem:[%s939_s1 + $0x8] sm:$0xff]  ;;  %v30_v10 = vld [vmem:[%s942_s4] sm:$0xf]  ;;  %v752_v11 = vld [vmem:[%s939_s1 + $0x10] sm:$0xff] }
   0x7   :  { %142 = vmatprep.mubr.f32.mxu0 %v676_v2  ;;  %39 = vperm.xlu0 %616, %v26_v7   ;;  %v760_v12 = vld [vmem:[%s939_s1 + $0x18] sm:$0xff] }
   0x9   :  { %49 = vperm.xlu1 %617, %v28_v8  }
   0xa   :  { %583 = vmatmul.mubr.msk.f32.gmra.mrb[2].mxu0 %vm54_vm1, %v741_v9 }
   0xb   :  { %148 = vmatprep.mubr.f32.mxu0 %v676_v2  ;;  %235 = vperm.xlu0 %616, %v30_v10  }
   0xe   :  { %584 = vmatmul.mubr.msk.f32.gmra.mrb[4].mxu0 %vm54_vm1, %v752_v11 }
   0xf   :  { %154 = vmatprep.mubr.f32.mxu0 %v676_v2 }
  0x12   :  { %585 = vmatmul.mubr.msk.f32.gmra.mrb[6].mxu0 %vm54_vm1, %v760_v12 }
  0x13   :  { %551 = vmatprep.mubr.f32.mxu0 %v676_v2 }
  0x82   :  { %v765_v13 = vpop.permute.xlu0 %34 }
  0x84   :  { %v784_v26 = vpop.permute.xlu1 %44 }
  0x86   :  { %v775_v19 = vpop.permute.xlu0 %39 }
  0x88   :  { %v805_v44 = vpop.permute.xlu1 %49 }
  0xd9   :  { %v138_v14 = vpop.f32.mrb[0].mxu0 }
  0xda   :  { %v768_v15 = vadd.f32 %v138_v14, %v765_v13  ;;  %v140_v16 = vpop.f32.mrb[1].mxu0 }
  0xdb   :  { %v771_v17 = vadd.f32 %v140_v16, %v765_v13 }
  0xdc   :  { %v161_v18 = vmul.f32 %v768_v15, %v768_v15 }
  0xdd   :  { %v162_v20 = vmul.f32 %v771_v17, %v771_v17  ;;  %v144_v21 = vpop.f32.mrb[2].mxu0 }
  0xde   :  { %v169_v22 = vmul.f32 %v161_v18, %v768_v15  ;;  %v781_v23 = vadd.f32 %v144_v21, %v775_v19  ;;  %v146_v24 = vpop.f32.mrb[3].mxu0 }
  0xdf   :  { %v170_v25 = vmul.f32 %v162_v20, %v771_v17  ;;  %v787_v27 = vadd.f32 %v146_v24, %v775_v19 }
  0xe0   :  { %v177_v28 = vmul.f32 0.044715, %v169_v22  ;;  %v163_v29 = vmul.f32 %v781_v23, %v781_v23 }
  0xe1   :  { %v178_v30 = vmul.f32 0.044715, %v170_v25  ;;  %v164_v31 = vmul.f32 %v787_v27, %v787_v27  ;;  %v150_v32 = vpop.f32.mrb[4].mxu0 }
  0xe2   :  { %v185_v33 = vadd.f32 %v177_v28, %v768_v15  ;;  %v171_v34 = vmul.f32 %v163_v29, %v781_v23  ;;  %v796_v35 = vadd.f32 %v150_v32, %v784_v26  ;;  %v152_v36 = vpop.f32.mrb[5].mxu0 }
  0xe3   :  { %v172_v37 = vmul.f32 %v164_v31, %v787_v27  ;;  %v800_v38 = vadd.f32 %v152_v36, %v784_v26  ;;  %v186_v39 = vadd.f32 %v178_v30, %v771_v17 }
  0xe4   :  { %v193_v40 = vmul.f32 0.7978846, %v185_v33  ;;  %v179_v41 = vmul.f32 0.044715, %v171_v34  ;;  %v165_v42 = vmul.f32 %v796_v35, %v796_v35 }
  0xe5   :  { %v180_v43 = vmul.f32 0.044715, %v172_v37  ;;  %v166_v45 = vmul.f32 %v800_v38, %v800_v38  ;;  %v156_v46 = vpop.f32.mrb[6].mxu0  ;;  %v194_v47 = vmul.f32 0.7978846, %v186_v39 }
  0xe6   :  { %v187_v48 = vadd.f32 %v179_v41, %v781_v23  ;;  %v173_v49 = vmul.f32 %v165_v42, %v796_v35  ;;  %v812_v50 = vadd.f32 %v156_v46, %v805_v44  ;;  %v158_v51 = vpop.f32.mrb[7].mxu0  ;;  %620 = vtanh.f32 %v193_v40 }
  0xe7   :  { %v174_v52 = vmul.f32 %v166_v45, %v800_v38  ;;  %v816_v53 = vadd.f32 %v158_v51, %v805_v44  ;;  %v188_v54 = vadd.f32 %v180_v43, %v787_v27  ;;  %622 = vtanh.f32 %v194_v47 }
  0xe8   :  { %v195_v55 = vmul.f32 0.7978846, %v187_v48  ;;  %v181_v56 = vmul.f32 0.044715, %v173_v49  ;;  %v167_v57 = vmul.f32 %v812_v50, %v812_v50 }
  0xe9   :  { %v182_v58 = vmul.f32 0.044715, %v174_v52  ;;  %v168_v59 = vmul.f32 %v816_v53, %v816_v53  ;;  %v196_v60 = vmul.f32 0.7978846, %v188_v54 }
  0xea   :  { %v189_v61 = vadd.f32 %v181_v56, %v796_v35  ;;  %v175_v62 = vmul.f32 %v167_v57, %v812_v50  ;;  %624 = vtanh.f32 %v195_v55 }
  0xeb   :  { %v190_v63 = vadd.f32 %v182_v58, %v800_v38  ;;  %v176_v0 = vmul.f32 %v168_v59, %v816_v53  ;;  %626 = vtanh.f32 %v196_v60  ;;  %v843_v60 = vld [vmem:[%s941_s3] sm:$0xf] }
  0xec   :  { %v197_v1 = vmul.f32 0.7978846, %v189_v61  ;;  %v183_v3 = vmul.f32 0.044715, %v175_v62 }
  0xed   :  { %v198_v5 = vmul.f32 0.7978846, %v190_v63  ;;  %v184_v6 = vmul.f32 0.044715, %v176_v0 }
  0xee   :  { %628 = vtanh.f32 %v197_v1  ;;  %v191_v7 = vadd.f32 %v183_v3, %v812_v50 }
  0xef   :  { %630 = vtanh.f32 %v198_v5  ;;  %v192_v8 = vadd.f32 %v184_v6, %v816_v53 }
  0xf0   :  { %v621_v10 = vpop.eup %620  ;;  %v199_v14 = vmul.f32 0.7978846, %v191_v7 }
  0xf1   :  { %v623_v16 = vpop.eup %622  ;;  %v200_v18 = vmul.f32 0.7978846, %v192_v8  ;;  %v209_v20 = vadd.f32 1.0, %v621_v10 }
  0xf2   :  { %632 = vtanh.f32 %v199_v14  ;;  %v210_v21 = vadd.f32 1.0, %v623_v16 }
  0xf3   :  { %634 = vtanh.f32 %v200_v18  ;;  %v217_v28 = vmul.f32 0.5, %v209_v20 }
  0xf4   :  { %v625_v22 = vpop.eup %624  ;;  %v218_v30 = vmul.f32 0.5, %v210_v21 }
  0xf5   :  { %v627_v24 = vpop.eup %626  ;;  %v211_v25 = vadd.f32 1.0, %v625_v22  ;;  %v225_v36 = vmul.f32 %v217_v28, %v768_v15 }
  0xf6   :  { %v212_v29 = vadd.f32 1.0, %v627_v24  ;;  %v226_v40 = vmul.f32 %v218_v30, %v771_v17  ;;  %v587_v17 = vld [vmem:[%s938_s0 + $0x8] sm:$0xff]  ;;  %s678_s0 = smov [#allocation2]  }
  0xf7   :  { %v219_v31 = vmul.f32 0.5, %v211_v25  ;;  %v321_v59 = vcombine.high %v587_v17, %v587_v17  ;;  %s569_s3 = sshll.u32 %s678_s0, 4  ;;  %s570_s3 = int_to_ptr.vmem [resolvable:$true] %s569_s3 }
  0xf8   :  { %v629_v32 = vpop.eup %628  ;;  %v220_v33 = vmul.f32 0.5, %v212_v29  ;;  %s652_s14 = scalar_lea.vmem %s570_s3, 256  ;;  %p657_p1 = scmp.lt.s32.totalorder %s570_s3, %s570_s3 }
  0xf9   :  { %v631_v34 = vpop.eup %630  ;;  %v227_v37 = vmul.f32 %v219_v31, %v781_v23  ;;  %v213_v39 = vadd.f32 1.0, %v629_v32  ;;  %p653_p0 = scmp.ne.s32.totalorder %s570_s3, %s652_s14  ;;  %p658_p2 = scmp.lt.s32.totalorder %s652_s14, %s652_s14 }
  0xfa   :  { %v228_v41 = vmul.f32 %v220_v33, %v787_v27  ;;  %v214_v42 = vadd.f32 1.0, %v631_v34 }
  0xfb   :  { %v597_v43 = vpack.c.bf16 %v227_v37, %v225_v36  ;;  %v221_v49 = vmul.f32 0.5, %v213_v39  ;;  %p659_p3 = por %p658_p2, %p657_p1 }
  0xfc   :  { %v633_v45 = vpop.eup %632  ;;  %v595_v46 = vpack.c.bf16 %v228_v41, %v226_v40  ;;  %v222_v52 = vmul.f32 0.5, %v214_v42 }
  0xfd   :  { %v635_v47 = vpop.eup %634  ;;  %v215_v48 = vadd.f32 1.0, %v633_v45  ;;  %v229_v23 = vmul.f32 %v221_v49, %v796_v35  ;;  %v861_v35 = vpop.permute.xlu0 %235  ;;  %p660_p4 = pnand %p659_p3, %p653_p0 }
  0xfe   :  { %596 = vmatprep.subr.bf16.mxu1 %v595_v46  ;;  %v216_v51 = vadd.f32 1.0, %v635_v47  ;;  %v230_v27 = vmul.f32 %v222_v52, %v800_v38 }
  0xff   :  { %598 = vmatpush1.bf16.msra.mxu1 %v597_v43  ;;  %v223_v54 = vmul.f32 0.5, %v215_v48 }
 0x100   :  { %v224_v15 = vmul.f32 0.5, %v216_v51 }
 0x101   :  { %v231_v55 = vmul.f32 %v223_v54, %v812_v50 }
 0x102   :  { %v232_v56 = vmul.f32 %v224_v15, %v816_v53 }
 0x103   :  { %v601_v57 = vpack.c.bf16 %v231_v55, %v229_v23 }
 0x104   :  { %v599_v58 = vpack.c.bf16 %v232_v56, %v230_v27 }
 0x106   :  { %600 = vmatprep.subr.bf16.mxu1 %v599_v58 }
 0x107   :  { %602 = vmatpush1.bf16.msra.mxu1 %v601_v57 }
 0x108   :  { %588 = vmatprep.subr.msk.mxu1 %vm67_vm0, %v321_v59 }
 0x10a   :  { %586 = vmatmul.mubr.msk.f32.vlgmr.msra.gmra.mrb[0].mxu1 %vm238_vm2, %v843_v60 }
 0x10b   :  { %589 = vmatpush1.msk.msra.mxu1 %vm67_vm0, %v587_v17  ;;  %390 = vmatprep.mubr.f32.mxu1 %v676_v2 }
 0x10e   :  { %590 = vmatmul.mubr.msk.f32.vlgmr.msra.gmra.mrb[2].mxu1 %vm54_vm1, %v722_v4 }
 0x10f   :  { %396 = vmatprep.mubr.f32.mxu1 %v676_v2 }
 0x112   :  { %591 = vmatmul.mubr.msk.f32.gmra.mrb[4].mxu1 %vm54_vm1, %v741_v9 }
 0x113   :  { %402 = vmatprep.mubr.f32.mxu1 %v676_v2 }
 0x116   :  { %592 = vmatmul.mubr.msk.f32.gmra.mrb[6].mxu1 %vm54_vm1, %v752_v11 }
 0x117   :  { %408 = vmatprep.mubr.f32.mxu1 %v676_v2 }
 0x11a   :  { %593 = vmatmul.mubr.msk.f32.gmra.mrb[8].mxu1 %vm54_vm1, %v760_v12 }
 0x1dd   :  { %v308_v38 = vpop.f32.mrb[0].mxu1 }
 0x1de   :  { %v309_v4 = vadd.f32 %v308_v38, %v861_v35  ;;  %v310_v50 = vpop.f32.mrb[1].mxu1 }
 0x1df   :  { %v311_v53 = vadd.f32 %v310_v50, %v861_v35 }
 0x1e1   :  { %v315_v61 = vcombine.low %v309_v4, %v311_v53  ;;  %v392_v9 = vpop.f32.mrb[2].mxu1 }
 0x1e2   :  { %v866_v62 = vadd.f32 %v392_v9, %v765_v13  ;;  %v394_v63 = vpop.f32.mrb[3].mxu1 }
 0x1e3   :  { %317 = vst [vmem:[#allocation2] sm:$0xff] %v315_v61  ;;  %v869_v2 = vadd.f32 %v394_v63, %v765_v13 }
 0x1e4   :  { %v415_v11 = vmul.f32 %v866_v62, %v866_v62 }
 0x1e5   :  { %v416_v12 = vmul.f32 %v869_v2, %v869_v2  ;;  %v398_v0 = vpop.f32.mrb[4].mxu1 }
 0x1e6   :  { %v423_v1 = vmul.f32 %v415_v11, %v866_v62  ;;  %v877_v3 = vadd.f32 %v398_v0, %v775_v19  ;;  %v400_v5 = vpop.f32.mrb[5].mxu1 }
 0x1e7   :  { %v424_v6 = vmul.f32 %v416_v12, %v869_v2  ;;  %v881_v7 = vadd.f32 %v400_v5, %v775_v19 }
 0x1e8   :  { %v431_v13 = vmul.f32 0.044715, %v423_v1  ;;  %v417_v8 = vmul.f32 %v877_v3, %v877_v3 }
 0x1e9   :  { %v432_v10 = vmul.f32 0.044715, %v424_v6  ;;  %v418_v14 = vmul.f32 %v881_v7, %v881_v7  ;;  %v404_v16 = vpop.f32.mrb[6].mxu1 }
 0x1ea   :  { %v439_v18 = vadd.f32 %v431_v13, %v866_v62  ;;  %v425_v20 = vmul.f32 %v417_v8, %v877_v3  ;;  %v890_v21 = vadd.f32 %v404_v16, %v784_v26  ;;  %v406_v22 = vpop.f32.mrb[7].mxu1 }
 0x1eb   :  { %v440_v19 = vadd.f32 %v432_v10, %v869_v2  ;;  %v426_v24 = vmul.f32 %v418_v14, %v881_v7  ;;  %v895_v25 = vadd.f32 %v406_v22, %v784_v26 }
 0x1ec   :  { %v447_v28 = vmul.f32 0.7978846, %v439_v18  ;;  %v433_v29 = vmul.f32 0.044715, %v425_v20  ;;  %v419_v30 = vmul.f32 %v890_v21, %v890_v21 }
 0x1ed   :  { %v448_v31 = vmul.f32 0.7978846, %v440_v19  ;;  %v434_v32 = vmul.f32 0.044715, %v426_v24  ;;  %v420_v33 = vmul.f32 %v895_v25, %v895_v25  ;;  %v410_v34 = vpop.f32.mrb[8].mxu1 }
 0x1ee   :  { %636 = vtanh.f32 %v447_v28  ;;  %v441_v36 = vadd.f32 %v433_v29, %v877_v3  ;;  %v427_v37 = vmul.f32 %v419_v30, %v890_v21  ;;  %v904_v39 = vadd.f32 %v410_v34, %v805_v44  ;;  %v412_v26 = vpop.f32.mrb[9].mxu1 }
 0x1ef   :  { %638 = vtanh.f32 %v448_v31  ;;  %v442_v40 = vadd.f32 %v434_v32, %v881_v7  ;;  %v428_v41 = vmul.f32 %v420_v33, %v895_v25  ;;  %v413_v42 = vadd.f32 %v412_v26, %v805_v44 }
 0x1f0   :  { %v449_v43 = vmul.f32 0.7978846, %v441_v36  ;;  %v435_v45 = vmul.f32 0.044715, %v427_v37  ;;  %v421_v46 = vmul.f32 %v904_v39, %v904_v39 }
 0x1f1   :  { %v450_v47 = vmul.f32 0.7978846, %v442_v40  ;;  %v436_v48 = vmul.f32 0.044715, %v428_v41  ;;  %v422_v49 = vmul.f32 %v413_v42, %v413_v42 }
 0x1f2   :  { %640 = vtanh.f32 %v449_v43  ;;  %v443_v51 = vadd.f32 %v435_v45, %v890_v21  ;;  %v429_v52 = vmul.f32 %v421_v46, %v904_v39 }
 0x1f3   :  { %642 = vtanh.f32 %v450_v47  ;;  %v444_v54 = vadd.f32 %v436_v48, %v895_v25  ;;  %v430_v15 = vmul.f32 %v422_v49, %v413_v42 }
 0x1f4   :  { %v451_v23 = vmul.f32 0.7978846, %v443_v51  ;;  %v437_v55 = vmul.f32 0.044715, %v429_v52 }
 0x1f5   :  { %v452_v44 = vmul.f32 0.7978846, %v444_v54  ;;  %v438_v17 = vmul.f32 0.044715, %v430_v15 }
 0x1f6   :  { %644 = vtanh.f32 %v451_v23  ;;  %v445_v27 = vadd.f32 %v437_v55, %v904_v39 }
 0x1f7   :  { %646 = vtanh.f32 %v452_v44  ;;  %v446_v56 = vadd.f32 %v438_v17, %v413_v42 }
 0x1f8   :  { %v637_v57 = vpop.eup %636  ;;  %v453_v58 = vmul.f32 0.7978846, %v445_v27 }
 0x1f9   :  { %v639_v59 = vpop.eup %638  ;;  %v463_v38 = vadd.f32 1.0, %v637_v57  ;;  %v454_v4 = vmul.f32 0.7978846, %v446_v56 }
 0x1fa   :  { %648 = vtanh.f32 %v453_v58  ;;  %v464_v50 = vadd.f32 1.0, %v639_v59 }
 0x1fb   :  { %650 = vtanh.f32 %v454_v4  ;;  %v471_v9 = vmul.f32 0.5, %v463_v38 }
 0x1fc   :  { %v641_v53 = vpop.eup %640  ;;  %v472_v12 = vmul.f32 0.5, %v464_v50 }
 0x1fd   :  { %v643_v61 = vpop.eup %642  ;;  %v465_v63 = vadd.f32 1.0, %v641_v53  ;;  %v479_v13 = vmul.f32 %v471_v9, %v866_v62 }
 0x1fe   :  { %v466_v11 = vadd.f32 1.0, %v643_v61  ;;  %v480_v14 = vmul.f32 %v472_v12, %v869_v2 }
 0x1ff   :  { %v473_v0 = vmul.f32 0.5, %v465_v63 }
 0x200   :  { %v645_v1 = vpop.eup %644  ;;  %v474_v5 = vmul.f32 0.5, %v466_v11 }
 0x201   :  { %v647_v6 = vpop.eup %646  ;;  %v481_v8 = vmul.f32 %v473_v0, %v877_v3  ;;  %v467_v10 = vadd.f32 1.0, %v645_v1 }
 0x202   :  { %v482_v16 = vmul.f32 %v474_v5, %v881_v7  ;;  %v468_v18 = vadd.f32 1.0, %v647_v6 }
 0x203   :  { %v605_v20 = vpack.c.bf16 %v481_v8, %v479_v13  ;;  %v475_v28 = vmul.f32 0.5, %v467_v10 }
 0x204   :  { %v649_v22 = vpop.eup %648  ;;  %v603_v19 = vpack.c.bf16 %v482_v16, %v480_v14  ;;  %v476_v31 = vmul.f32 0.5, %v468_v18 }
 0x205   :  { %v651_v24 = vpop.eup %650  ;;  %v469_v29 = vadd.f32 1.0, %v649_v22  ;;  %v483_v3 = vmul.f32 %v475_v28, %v890_v21 }
 0x206   :  { %604 = vmatprep.subr.bf16.mxu0 %v603_v19  ;;  %v470_v30 = vadd.f32 1.0, %v651_v24  ;;  %v484_v2 = vmul.f32 %v476_v31, %v895_v25 }
 0x207   :  { %v477_v32 = vmul.f32 0.5, %v469_v29  ;;  %606 = vmatpush1.bf16.msra.mxu0 %v605_v20 }
 0x208   :  { %v478_v62 = vmul.f32 0.5, %v470_v30 }
 0x209   :  { %v485_v33 = vmul.f32 %v477_v32, %v904_v39 }
 0x20a   :  { %v486_v7 = vmul.f32 %v478_v62, %v413_v42 }
 0x20b   :  { %v609_v34 = vpack.c.bf16 %v485_v33, %v483_v3 }
 0x20c   :  { %v607_v36 = vpack.c.bf16 %v486_v7, %v484_v2 }
 0x20e   :  { %608 = vmatprep.subr.bf16.mxu0 %v607_v36 }
 0x20f   :  { %610 = vmatpush1.bf16.msra.mxu0 %v609_v34 }
 0x212   :  { %594 = vmatmul.mubr.msk.f32.vlgmr.msra.gmra.mrb[8].mxu0 %vm238_vm2, %v843_v60 }
 0x2e5   :  { %v553_v37 = vpop.f32.mrb[8].mxu0 }
 0x2e6   :  { %v554_v26 = vadd.f32 %v553_v37, %v861_v35  ;;  %v555_v40 = vpop.f32.mrb[9].mxu0 }
 0x2e7   :  { %v556_v21 = vadd.f32 %v555_v40, %v861_v35 }
 0x2e9   :  { %v560_v39 = vcombine.low %v554_v26, %v556_v21 }
 0x2eb   :  { %563 = vst [vmem:[#allocation2 + $0x8] sm:$0xff] %v560_v39 }
 0x2ec   :  { %663 = shalt.err (!%p660_p4)
}
 0x2ed   :  { %s664_s17 = scalar_lea.hbm %s943_s5, 256 }
 0x2ee   :  { %p665_p5 = scmp.ne.s32.totalorder %s943_s5, %s664_s17  ;;  %p668_p6 = scmp.lt.u32.totalorder %s664_s17, %s943_s5 }
 0x2f0   :  { %p670_p7 = pnand %p668_p6, %p665_p5 }
 0x2f2   :  { %673 = shalt.err (!%p670_p7)
}
 0x2f3   :  { %s679_s22 = smov 128   ;;  %s680_s23 = smov 8  }
 0x2f4   :  { %575 = dma.vmem_to_hbm [thread:$0]  %s570_s3, 256, %s943_s5, [#allocation3], %s679_s22, %s679_s22, %s680_s23  }
 0x2f5   :  { %674 = dma.done.wait [#allocation3], 256  }
 0x2f6   :  { %675 = vsyncadd [#allocation3], 4294967040 }
 0x2f7   :  { %579 = vsyncpa [#allocation3], 1 }

</bundles_post_ra>
